<compile_context>
chip_gen: v6e
topology: v6e:2x2x1
jax: 0.10.0
libtpu: 0.0.40
codegen_flags: <defaults>
</compile_context>

<pallas_src>
import functools

import jax
import jax.numpy as jnp
from jax import lax
from jax.experimental import pallas as pl
from jax.experimental.pallas import tpu as pltpu


def _as_i32(v):
    """Reinterpret a uint32 literal as a (possibly negative) int32 Python int."""
    v &= 0xFFFFFFFF
    return v - (1 << 32) if v >= (1 << 31) else v


_M1 = _as_i32(0x7FEB352D)    # splitmix32 multipliers
_M2 = _as_i32(0x846CA68B)
_GOLD = _as_i32(0x9E3779B9)  # golden-ratio constant to decorrelate nearby seeds


def _round_up(x, m):
    return (x + m - 1) // m * m


def _classifier_kernel(seed_ref, x_ref, w1_ref, b1_ref, w2_ref, b2_ref, slab_ref,
                       *, dropout_rate, training):
    # fc1: [TB, I] @ [I, E] + [1, E]
    embd = jnp.dot(x_ref[...], w1_ref[...],
                   preferred_element_type=jnp.float32) + b1_ref[...]

    if training and dropout_rate > 0.0:
        if dropout_rate >= 1.0:
            embd = jnp.zeros_like(embd)
        else:
            tb, e = embd.shape
            seed = seed_ref[0]
            # Global flat element index (unique across batch tiles via program_id).
            row = lax.broadcasted_iota(jnp.int32, (tb, e), 0) + pl.program_id(0) * tb
            col = lax.broadcasted_iota(jnp.int32, (tb, e), 1)
            h = row * jnp.int32(e) + col + seed * jnp.int32(_GOLD)
            # splitmix32 finalizer, done in int32 with masks emulating logical shifts
            # (avoids unsigned types; identical bit pattern, wraps on overflow).
            h = h ^ ((h >> 16) & 0xFFFF)
            h = h * jnp.int32(_M1)
            h = h ^ ((h >> 15) & 0x1FFFF)
            h = h * jnp.int32(_M2)
            h = h ^ ((h >> 16) & 0xFFFF)
            r = h & jnp.int32((1 << 23) - 1)                      # 23 uniform bits, >= 0
            thresh = jnp.int32(int(round(dropout_rate * (1 << 23))))
            keep = r >= thresh                                    # P(keep) = 1 - p
            scale = jnp.float32(1.0 / (1.0 - dropout_rate))
            embd = jnp.where(keep, embd * scale, jnp.float32(0.0))

    # fc2 (output columns pre-padded to SLAB - E): [TB, E] @ [E, C_pad] + [1, C_pad]
    out = jnp.dot(embd, w2_ref[...],
                  preferred_element_type=jnp.float32) + b2_ref[...]

    # Single lane-dense [TB, SLAB] store: [embd | padded logits].
    slab_ref[...] = jnp.concatenate([embd, out], axis=-1).astype(slab_ref.dtype)


def prepare_params(params):
    """One-time weight prep: transpose to [in, out], pad fc2 columns to lane width."""
    e, i = params["w1"].shape
    c = params["w2"].shape[0]
    slab = _round_up(e + c, 128)
    c_pad = slab - e
    w1_t = jnp.asarray(params["w1"], jnp.float32).T                    # [I, E]
    b1 = jnp.asarray(params["b1"], jnp.float32).reshape(1, e)          # [1, E]
    w2_t = jnp.asarray(params["w2"], jnp.float32).T                    # [E, C]
    w2_p = jnp.zeros((e, c_pad), jnp.float32).at[:, :c].set(w2_t)      # [E, C_pad]
    b2_p = jnp.zeros((1, c_pad), jnp.float32).at[:, :c].set(
        jnp.asarray(params["b2"], jnp.float32).reshape(1, c))          # [1, C_pad]
    return {"w1_t": w1_t, "b1": b1, "w2_p": w2_p, "b2_p": b2_p,
            "input_size": i, "embedding_size": e, "classes": c, "slab": slab}


def classifier_forward(x, prep, *, dropout_rate=0.5, training=False, seed=0):
    """Classifier forward pass as one Pallas TPU kernel.

    Args:
      x:    [B, input_size] float32
      prep: output of prepare_params(torch-layout params)
    Returns:
      (out [B, classes], embd [B, embedding_size]) -- embd is post-dropout.
    """
    b, i = x.shape
    e, c, slab = prep["embedding_size"], prep["classes"], prep["slab"]
    c_pad = slab - e
    assert i == prep["input_size"]

    # Batch tile: multiple of 8, capped so double-buffered tiles fit any generation's VMEM.
    tb = min(1024, _round_up(b, 8))
    b_pad = _round_up(b, tb)
    x_p = x if b_pad == b else jnp.pad(x, ((0, b_pad - b), (0, 0)))
    seed_arr = jnp.asarray([seed], dtype=jnp.int32)

    kernel = functools.partial(_classifier_kernel,
                               dropout_rate=float(dropout_rate),
                               training=bool(training))

    flops = 2 * b_pad * (i * e + e * c_pad)
    bytes_accessed = 4 * (b_pad * i + b_pad * slab + i * e + e + e * c_pad + c_pad)

    slab_out = pl.pallas_call(
        kernel,
        out_shape=jax.ShapeDtypeStruct((b_pad, slab), jnp.float32),
        grid=(b_pad // tb,),
        in_specs=[
            pl.BlockSpec(memory_space=pltpu.MemorySpace.SMEM),       # seed scalar
            pl.BlockSpec((tb, i), lambda g: (g, 0)),                 # x tile
            pl.BlockSpec((i, e), lambda g: (0, 0)),                  # w1^T (resident)
            pl.BlockSpec((1, e), lambda g: (0, 0)),                  # b1   (resident)
            pl.BlockSpec((e, c_pad), lambda g: (0, 0)),              # w2^T padded (resident)
            pl.BlockSpec((1, c_pad), lambda g: (0, 0)),              # b2 padded   (resident)
        ],
        out_specs=pl.BlockSpec((tb, slab), lambda g: (g, 0)),        # lane-dense slab
        compiler_params=pltpu.CompilerParams(
            dimension_semantics=("parallel",),
            vmem_limit_bytes=32 * 1024 * 1024),
        cost_estimate=pl.CostEstimate(flops=flops, transcendentals=0,
                                      bytes_accessed=bytes_accessed),
    )(seed_arr, x_p, prep["w1_t"], prep["b1"], prep["w2_p"], prep["b2_p"])

    embd = slab_out[:b, :e]
    out = slab_out[:b, e:e + c]
    return out, embd


def init_params(key, classes, input_size=16, embedding_size=64):
    """torch.nn.Linear default init: U(-1/sqrt(fan_in), +1/sqrt(fan_in))."""
    k1, k2, k3, k4 = jax.random.split(key, 4)
    b1 = 1.0 / (input_size ** 0.5)
    b2 = 1.0 / (embedding_size ** 0.5)
    return {
        "w1": jax.random.uniform(k1, (embedding_size, input_size), jnp.float32, -b1, b1),
        "b1": jax.random.uniform(k2, (embedding_size,), jnp.float32, -b1, b1),
        "w2": jax.random.uniform(k3, (classes, embedding_size), jnp.float32, -b2, b2),
        "b2": jax.random.uniform(k4, (classes,), jnp.float32, -b2, b2),
    }


if __name__ == "__main__":
    key = jax.random.PRNGKey(0)
    kx, kp = jax.random.split(key)

    batch = 8
    input_size = 16
    embedding_size = 64
    classes = 10
    dropout_rate = 0.5

    x = jax.random.normal(kx, (batch, input_size), dtype=jnp.float32)
    params = init_params(kp, classes, input_size, embedding_size)
    prep = prepare_params(params)

    # --- Eval mode: dropout is identity; compare against plain-JAX reference. ---
    out_eval, embd_eval = classifier_forward(
        x, prep, dropout_rate=dropout_rate, training=False)
    jax.block_until_ready((out_eval, embd_eval))

    embd_ref = x @ params["w1"].T + params["b1"]
    out_ref = embd_ref @ params["w2"].T + params["b2"]
    assert embd_eval.shape == (batch, embedding_size)
    assert out_eval.shape == (batch, classes)
    assert jnp.allclose(embd_eval, embd_ref, atol=2e-3, rtol=2e-3)
    assert jnp.allclose(out_eval, out_ref, atol=2e-3, rtol=2e-3)

    # --- Training mode: in-kernel integer-hash dropout, deterministic given the seed. ---
    out_train, embd_train = classifier_forward(
        x, prep, dropout_rate=dropout_rate, training=True, seed=1234)
    jax.block_until_ready((out_train, embd_train))
    assert out_train.shape == (batch, classes)
    assert embd_train.shape == (batch, embedding_size)

    # Each post-dropout activation is either 0 or pre-dropout * 1/(1-p).
    kept = embd_train != 0
    expected_embd = jnp.where(kept, embd_ref / (1.0 - dropout_rate), 0.0)
    assert jnp.allclose(embd_train, expected_embd, atol=2e-3, rtol=2e-3)
    # Logits must be consistent with the post-dropout embedding.
    out_expected = embd_train @ params["w2"].T + params["b2"]
    assert jnp.allclose(out_train, out_expected, atol=2e-3, rtol=2e-3)
    # Keep-rate sanity (p=0.5 over 512 elements).
    keep_frac = jnp.mean(kept.astype(jnp.float32))
    assert 0.25 < float(keep_frac) < 0.75

    print("KERNEL_OK")
</pallas_src>

<mosaic_0001>
module attributes {stable_mosaic.version = 11 : i64} {
  func.func @_classifier_kernel(%arg0: i32, %arg1: memref<1xi32, #tpu.memory_space<smem>>, %arg2: memref<8x16xf32, #tpu.memory_space<vmem>>, %arg3: memref<16x64xf32, #tpu.memory_space<vmem>>, %arg4: memref<1x64xf32, #tpu.memory_space<vmem>>, %arg5: memref<64x64xf32, #tpu.memory_space<vmem>>, %arg6: memref<1x64xf32, #tpu.memory_space<vmem>>, %arg7: memref<8x128xf32, #tpu.memory_space<vmem>>) attributes {dimension_semantics = [#tpu.dimension_semantics<parallel>], iteration_bounds = array<i64: 1>, scalar_prefetch = 0 : i64, scratch_operands = 0 : i64, tpu.core_type = #tpu.core_type<tc>, window_params = [{transform_indices = @transform_0, window_bounds = array<i64: 1>}, {transform_indices = @transform_1, window_bounds = array<i64: 8, 16>}, {pipeline_mode = #tpu.pipeline_mode<synchronous>, transform_indices = @transform_2, window_bounds = array<i64: 16, 64>}, {pipeline_mode = #tpu.pipeline_mode<synchronous>, transform_indices = @transform_3, window_bounds = array<i64: 1, 64>}, {pipeline_mode = #tpu.pipeline_mode<synchronous>, transform_indices = @transform_4, window_bounds = array<i64: 64, 64>}, {pipeline_mode = #tpu.pipeline_mode<synchronous>, transform_indices = @transform_5, window_bounds = array<i64: 1, 64>}, {transform_indices = @transform_6, window_bounds = array<i64: 8, 128>}]} {
    %c0 = arith.constant 0 : index
    %c0_0 = arith.constant 0 : index
    %0 = vector.load %arg2[%c0, %c0_0] : memref<8x16xf32, #tpu.memory_space<vmem>>, vector<8x16xf32>
    %c0_1 = arith.constant 0 : index
    %c0_2 = arith.constant 0 : index
    %1 = vector.load %arg3[%c0_1, %c0_2] : memref<16x64xf32, #tpu.memory_space<vmem>>, vector<16x64xf32>
    %cst = arith.constant dense<0.000000e+00> : vector<8x64xf32>
    %2 = tpu.matmul %0, %1, %cst {dimension_numbers = #tpu.dot_dimension_numbers<[1], [0], [0], [1], [0, 0, 1, 1], [], []>} : vector<8x16xf32>, vector<16x64xf32>, vector<8x64xf32> -> vector<8x64xf32>
    %c0_3 = arith.constant 0 : index
    %c0_4 = arith.constant 0 : index
    %3 = vector.load %arg4[%c0_3, %c0_4] : memref<1x64xf32, #tpu.memory_space<vmem>>, vector<1x64xf32>
    %4 = vector.broadcast %3 : vector<1x64xf32> to vector<8x64xf32>
    %5 = arith.addf %2, %4 : vector<8x64xf32>
    %c0_5 = arith.constant 0 : index
    %c0_6 = arith.constant 0 : index
    %6 = vector.load %arg5[%c0_5, %c0_6] : memref<64x64xf32, #tpu.memory_space<vmem>>, vector<64x64xf32>
    %cst_7 = arith.constant dense<0.000000e+00> : vector<8x64xf32>
    %7 = tpu.matmul %5, %6, %cst_7 {dimension_numbers = #tpu.dot_dimension_numbers<[1], [0], [0], [1], [0, 0, 1, 1], [], []>} : vector<8x64xf32>, vector<64x64xf32>, vector<8x64xf32> -> vector<8x64xf32>
    %c0_8 = arith.constant 0 : index
    %c0_9 = arith.constant 0 : index
    %8 = vector.load %arg6[%c0_8, %c0_9] : memref<1x64xf32, #tpu.memory_space<vmem>>, vector<1x64xf32>
    %9 = vector.broadcast %8 : vector<1x64xf32> to vector<8x64xf32>
    %10 = arith.addf %7, %9 : vector<8x64xf32>
    %11 = tpu.concatenate %5, %10 in 1 : vector<8x64xf32>, vector<8x64xf32> -> vector<8x128xf32>
    %c0_10 = arith.constant 0 : index
    %c0_11 = arith.constant 0 : index
    %12 = vector.load %arg7[%c0_10, %c0_11] : memref<8x128xf32, #tpu.memory_space<vmem>>, vector<8x128xf32>
    tpu.vector_store %arg7[%c0_10, %c0_11], %11 {strides = array<i32>} : memref<8x128xf32, #tpu.memory_space<vmem>>, vector<8x128xf32>,
    return
  }
  func.func @transform_0(%arg0: i32) -> i32 {
    %c0_i32 = arith.constant 0 : i32
    %c0_i32_0 = arith.constant 0 : i32
    return %c0_i32 : i32
  }
  func.func @transform_1(%arg0: i32) -> (i32, i32) {
    %c0_i32 = arith.constant 0 : i32
    %c0_i32_0 = arith.constant 0 : i32
    return %arg0, %c0_i32 : i32, i32
  }
  func.func @transform_2(%arg0: i32) -> (i32, i32) {
    %c0_i32 = arith.constant 0 : i32
    %c0_i32_0 = arith.constant 0 : i32
    %c0_i32_1 = arith.constant 0 : i32
    return %c0_i32, %c0_i32_0 : i32, i32
  }
  func.func @transform_3(%arg0: i32) -> (i32, i32) {
    %c0_i32 = arith.constant 0 : i32
    %c0_i32_0 = arith.constant 0 : i32
    %c0_i32_1 = arith.constant 0 : i32
    return %c0_i32, %c0_i32_0 : i32, i32
  }
  func.func @transform_4(%arg0: i32) -> (i32, i32) {
    %c0_i32 = arith.constant 0 : i32
    %c0_i32_0 = arith.constant 0 : i32
    %c0_i32_1 = arith.constant 0 : i32
    return %c0_i32, %c0_i32_0 : i32, i32
  }
  func.func @transform_5(%arg0: i32) -> (i32, i32) {
    %c0_i32 = arith.constant 0 : i32
    %c0_i32_0 = arith.constant 0 : i32
    %c0_i32_1 = arith.constant 0 : i32
    return %c0_i32, %c0_i32_0 : i32, i32
  }
  func.func @transform_6(%arg0: i32) -> (i32, i32) {
    %c0_i32 = arith.constant 0 : i32
    %c0_i32_0 = arith.constant 0 : i32
    return %arg0, %c0_i32 : i32, i32
  }
}

</mosaic_0001>

<bundles_post_ra>
// kernel: tpu_custom_call.1
= control target key start
LH: loop header
LB: loop body
LE: loop exit
PB: predicated region body
PF: predicated region fallthrough
CT: control target
= control target key end

     0   :  { %12 = vsyncpa [#allocation4], 0  ;;  %s458_s0 = inlined_call_operand.<no memory space> [shape: s32[1], index: 0, kind: input, shape index: {}]   ;;  %s459_s1 = inlined_call_operand.hbm [shape: f32[8,16], index: 1, kind: input, shape index: {}]   ;;  %s460_s2 = inlined_call_operand.hbm [shape: f32[16,64], index: 2, kind: input, shape index: {}]   ;;  %s461_s3 = inlined_call_operand.vmem [shape: f32[1,64], index: 3, kind: input, shape index: {}]   ;;  %s462_s4 = inlined_call_operand.hbm [shape: f32[64,64], index: 4, kind: input, shape index: {}]   ;;  %s463_s5 = inlined_call_operand.vmem [shape: f32[1,64], index: 5, kind: input, shape index: {}]   ;;  %s464_s6 = inlined_call_operand.hbm [shape: f32[8,128], index: 6, kind: output, shape index: {}]  }
   0x1   :  { %13 = vsyncpa [#allocation7], 0 }
   0x2   :  { %14 = vsyncpa [#allocation5], 0  ;;  %s396_s0 = smov [#allocation6]  }
   0x3   :  { %s32_s21 = sshll.u32 %s396_s0, 4  ;;  %s33_s21 = int_to_ptr.vmem [resolvable:$true] %s32_s21 }
   0x4   :  { %s318_s22 = scalar_lea.vmem %s33_s21, 256  ;;  %p323_p1 = scmp.lt.s32.totalorder %s33_s21, %s33_s21 }
   0x5   :  { %p319_p0 = scmp.ne.s32.totalorder %s33_s21, %s318_s22  ;;  %p324_p2 = scmp.lt.s32.totalorder %s318_s22, %s318_s22 }
   0x7   :  { %p325_p3 = por %p324_p2, %p323_p1 }
   0x9   :  { %p326_p4 = pnand %p325_p3, %p319_p0 }
   0xb   :  { %329 = shalt.err (!%p326_p4)
}
   0xc   :  { %s397_s23 = smov 128   ;;  %s398_s24 = smov 8  }
   0xd   :  { %38 = dma.hbm_to_vmem [thread:$0]  %s460_s2, 256, %s33_s21, [#allocation7], %s397_s23, %s397_s23, %s398_s24  }
   0xe   :  { %s399_s27 = smov [#allocation3]   ;;  %s400_s29 = smov [#allocation8]  }
   0xf   :  { %s23_s28 = sshll.u32 %s399_s27, 4  ;;  %s46_s30 = sshll.u32 %s400_s29, 4  ;;  %s24_s28 = int_to_ptr.vmem [resolvable:$true] %s23_s28  ;;  %s47_s30 = int_to_ptr.vmem [resolvable:$true] %s46_s30 }
  0x10   :  { %s338_s7 = scalar_lea.vmem %s24_s28, 128  ;;  %p343_p6 = scmp.lt.s32.totalorder %s24_s28, %s24_s28 }
  0x11   :  { %p339_p5 = scmp.ne.s32.totalorder %s24_s28, %s338_s7  ;;  %p344_p7 = scmp.lt.s32.totalorder %s338_s7, %s338_s7 }
  0x13   :  { %p345_p8 = por %p344_p7, %p343_p6 }
  0x15   :  { %p346_p9 = pnand %p345_p8, %p339_p5 }
  0x17   :  { %349 = shalt.err (!%p346_p9)
}
  0x18   :  { %26 = dma.hbm_to_vmem [thread:$0]  %s459_s1, 128, %s24_s28, [#allocation4]  }
  0x19   :  { %s358_s10 = scalar_lea.vmem %s47_s30, 1024  ;;  %p363_p11 = scmp.lt.s32.totalorder %s47_s30, %s47_s30 }
  0x1a   :  { %p359_p10 = scmp.ne.s32.totalorder %s47_s30, %s358_s10  ;;  %p364_p12 = scmp.lt.s32.totalorder %s358_s10, %s358_s10 }
  0x1c   :  { %p365_p13 = por %p364_p12, %p363_p11 }
  0x1e   :  { %p366_p0 = pnand %p365_p13, %p359_p10 }
  0x20   :  { %369 = shalt.err (!%p366_p0)
}
  0x21   :  { %52 = dma.hbm_to_vmem [thread:$0]  %s462_s4, 1024, %s47_s30, [#allocation7], %s397_s23, %s397_s23, %s398_s24  }
  0x22   :  { %390 = dma.done.wait [#allocation4], 128  }
  0x23   :  { %391 = vsyncadd [#allocation4], 4294967168 }
  0x24   :  { %392 = dma.done.wait [#allocation7], 1280  }
  0x25   :  { %393 = vsyncadd [#allocation7], 4294966016  ;;  %v401_v0 = vmov 0.0   ;;  %vm402_vm0 = vmmov 0   ;;  %v66_v1 = vld [vmem:[#allocation6 + $0x8] sm:$0xff]  ;;  %v65_v2 = vld [vmem:[#allocation6] sm:$0xff] }
  0x26   :  { %275 = vmatprep.subr.mxu0 %v401_v0  ;;  %279 = vmatprep.mubr.msk.f32.mxu0 %vm402_vm0, %v401_v0  ;;  %v64_v3 = vld [vmem:[#allocation3] sm:$0xff]  ;;  %vm74_vm1 = vcmask 130048   ;;  %v155_v4 = vld [vmem:[#allocation8 + $0x38] sm:$0xff]  ;;  %v154_v5 = vld [vmem:[#allocation8 + $0x30] sm:$0xff]  ;;  %vm163_vm2 = vcmask 523264   ;;  %s403_s14 = smov 64  }
  0x27   :  { %282 = vmatprep.subr.mxu1 %v401_v0  ;;  %298 = vmatprep.mubr.msk.f32.mxu1 %vm402_vm0, %v401_v0  ;;  %v153_v6 = vld [vmem:[#allocation8 + $0x28] sm:$0xff]  ;;  %v152_v7 = vld [vmem:[#allocation8 + $0x20] sm:$0xff]  ;;  %v151_v8 = vld [vmem:[#allocation8 + $0x18] sm:$0xff]  ;;  %s404_s15 = smov [#allocation9]  }
  0x28   :  { %276 = vmatpush3.msra.mxu0 %v66_v1  ;;  %283 = vmatpush3.msra.mxu1 %v155_v4  ;;  %v150_v9 = vld [vmem:[#allocation8 + $0x10] sm:$0xff]  ;;  %v149_v10 = vld [vmem:[#allocation8 + $0x8] sm:$0xff]  ;;  %v148_v11 = vld [vmem:[#allocation8] sm:$0xff]  ;;  %s249_s16 = sshll.u32 %s404_s15, 4  ;;  %s250_s16 = int_to_ptr.vmem [resolvable:$true] %s249_s16 }
  0x29   :  { %277 = vmatprep.subr.mxu0 %v401_v0  ;;  %284 = vmatprep.subr.mxu1 %v401_v0  ;;  %v259_v12 = vld [vmem:[%s461_s3] ss:$0 sm:$0xff]  ;;  %s370_s3 = scalar_lea.vmem %s250_s16, 128  ;;  %p375_p2 = scmp.lt.s32.totalorder %s250_s16, %s250_s16 }
  0x2a   :  { %278 = vmatpush3.msra.mxu0 %v65_v2  ;;  %285 = vmatpush3.msra.mxu1 %v154_v5  ;;  %v261_v16 = vld [vmem:[%s463_s5] ss:$0 sm:$0xff]  ;;  %p371_p1 = scmp.ne.s32.totalorder %s250_s16, %s370_s3  ;;  %p376_p3 = scmp.lt.s32.totalorder %s370_s3, %s370_s3 }
  0x2b   :  { %280 = vmatmul.mubr.msk.f32.vlgmr.msra.gmra.mxu0 %vm74_vm1, %v64_v3  ;;  %286 = vmatprep.subr.mxu1 %v401_v0 }
  0x2c   :  { %287 = vmatpush3.msra.mxu1 %v153_v6  ;;  %p377_p4 = por %p376_p3, %p375_p2 }
  0x2d   :  { %288 = vmatprep.subr.mxu1 %v401_v0 }
  0x2e   :  { %289 = vmatpush3.msra.mxu1 %v152_v7  ;;  %p378_p5 = pnand %p377_p4, %p371_p1 }
  0x2f   :  { %290 = vmatprep.subr.mxu1 %v401_v0 }
  0x30   :  { %291 = vmatpush3.msra.mxu1 %v151_v8 }
  0x31   :  { %292 = vmatprep.subr.mxu1 %v401_v0 }
  0x32   :  { %293 = vmatpush3.msra.mxu1 %v150_v9 }
  0x33   :  { %294 = vmatprep.subr.mxu1 %v401_v0 }
  0x34   :  { %295 = vmatpush3.msra.mxu1 %v149_v10 }
  0x35   :  { %296 = vmatprep.subr.mxu1 %v401_v0 }
  0x36   :  { %297 = vmatpush3.msra.mxu1 %v148_v11 }
  0xeb   :  { %v144_v13 = vpop.f32.mrf.mxu0 }
  0xec   :  { %v145_v14 = vadd.f32 %v259_v12, %v144_v13 }
  0xed   :  { %v281_v15 = vpop.f32.mrf.mxu0 }
  0xee   :  { %299 = vmatmul.mubr.msk.f32.vlgmr.msra.gmra.mxu1 %vm163_vm2, %v145_v14 }
 0x1ae   :  { %v233_v17 = vpop.f32.mrf.mxu1 }
 0x1af   :  { %v234_v18 = vadd.f32 %v261_v16, %v233_v17 }
 0x1b0   :  { %v300_v19 = vpop.f32.mrf.mxu1 }
 0x1b1   :  { %238 = vrot.lane.b32.xlu0 %v234_v18, %s403_s14 }
 0x223   :  { %v239_v20 = vpop.permute.xlu0 %238 }
 0x224   :  { %v241_v21 = vsel %vm163_vm2, %v145_v14, %v239_v20 }
 0x225   :  { %242 = vst [vmem:[#allocation9] sm:$0xff] %v241_v21 }
 0x226   :  { %381 = shalt.err (!%p378_p5)
}
 0x227   :  { %252 = dma.vmem_to_hbm [thread:$0]  %s250_s16, 128, %s464_s6, [#allocation5]  }
 0x228   :  { %394 = dma.done.wait [#allocation5], 128  }
 0x229   :  { %395 = vsyncadd [#allocation5], 4294967168 }
 0x22a   :  { %256 = vsyncpa [#allocation4], 1 }
 0x22b   :  { %257 = vsyncpa [#allocation7], 1 }
 0x22c   :  { %258 = vsyncpa [#allocation5], 1 }

</bundles_post_ra>
